<compile_context>
chip_gen: v5e
topology: v5e:2x2
jax: 0.10.0
libtpu: 0.0.40
codegen_flags: <defaults>
</compile_context>

<pallas_src>
import jax
import jax.numpy as jnp
from jax.experimental import pallas as pl
from jax.experimental.pallas import tpu as pltpu


_LANE = 1024        # wide last dim (8 x 128) -> unmasked wide vst, big DMA descriptors
_TILE_ROWS = 512    # 512 x 1024 f32 = 2 MiB/block; 2x double-buffer in+out = 8 MiB VMEM


def _gcu_kernel(z_ref, o_ref):
    # One explicit up-cast per tile (free for f32; keeps bf16/fp16 inputs off
    # the per-op convert path on chips without native bf16 VPU/EUP).
    z = z_ref[...].astype(jnp.float32)
    o_ref[...] = (z * jnp.cos(z)).astype(o_ref.dtype)


def growing_cosine_unit(z: jax.Array) -> jax.Array:
    """Elementwise z * cos(z) via a Pallas TPU kernel (GrowingCosineUnit.forward)."""
    orig_shape = z.shape
    if z.size == 0:
        return z
    if not jnp.issubdtype(z.dtype, jnp.floating):
        # cos is only defined for floating inputs; promote like jnp would.
        z = z.astype(jnp.float32)
    dtype = z.dtype
    n = z.size

    flat = z.reshape(-1)
    lane = _LANE
    n_pad = pl.cdiv(n, lane) * lane
    padded = n_pad != n
    if padded:
        # Misaligned element count: one pad + one tail slice (slow path only).
        flat = jnp.pad(flat, (0, n_pad - n))
    rows = n_pad // lane

    # Big blocks for large inputs; full-extent row block for tiny inputs
    # (block rows == array rows is always a legal TPU block shape).
    tile_rows = _TILE_ROWS if rows >= _TILE_ROWS else rows
    slab = flat.reshape(rows, lane)

    grid = (pl.cdiv(rows, tile_rows),)  # ragged last block handled by masked writes
    out = pl.pallas_call(
        _gcu_kernel,
        out_shape=jax.ShapeDtypeStruct((rows, lane), dtype),
        grid_spec=pltpu.PrefetchScalarGridSpec(
            num_scalar_prefetch=0,
            grid=grid,
            in_specs=[pl.BlockSpec((tile_rows, lane), lambda i: (i, 0))],
            out_specs=pl.BlockSpec((tile_rows, lane), lambda i: (i, 0)),
        ),
        compiler_params=pltpu.CompilerParams(
            dimension_semantics=("parallel",),
        ),
        cost_estimate=pl.CostEstimate(
            flops=2 * n,            # mul + cos (advisory only)
            transcendentals=n,
            bytes_accessed=2 * n * jnp.dtype(dtype).itemsize,
        ),
    )(slab)

    if padded:
        return out.reshape(-1)[:n].reshape(orig_shape)
    return out.reshape(orig_shape)


if __name__ == "__main__":
    key = jax.random.PRNGKey(0)

    # Small NCHW input consistent with how the module is used inside a conv net.
    x = jax.random.normal(key, (2, 4, 16, 16), dtype=jnp.float32)  # n = 2048 -> fast path
    y = jax.block_until_ready(growing_cosine_unit(x))
    ref = x * jnp.cos(x)
    assert y.shape == x.shape and y.dtype == x.dtype
    assert jnp.allclose(y, ref, atol=1e-5, rtol=1e-5)

    # Misaligned shape to exercise the padded path (n = 1155, not a lane multiple).
    x2 = jax.random.normal(jax.random.PRNGKey(1), (3, 5, 7, 11), dtype=jnp.float32)
    y2 = jax.block_until_ready(growing_cosine_unit(x2))
    ref2 = x2 * jnp.cos(x2)
    assert y2.shape == x2.shape and y2.dtype == x2.dtype
    assert jnp.allclose(y2, ref2, atol=1e-5, rtol=1e-5)

    # bf16 path (single up-cast per tile inside the kernel).
    x3 = jax.random.normal(jax.random.PRNGKey(2), (2, 4, 16, 16), dtype=jnp.bfloat16)
    y3 = jax.block_until_ready(growing_cosine_unit(x3))
    ref3 = (x3.astype(jnp.float32) * jnp.cos(x3.astype(jnp.float32))).astype(jnp.bfloat16)
    assert y3.shape == x3.shape and y3.dtype == x3.dtype
    assert jnp.allclose(y3.astype(jnp.float32), ref3.astype(jnp.float32), atol=2e-2, rtol=2e-2)

    print("KERNEL_OK")
</pallas_src>

<mosaic_0001>
module attributes {stable_mosaic.version = 11 : i64} {
  func.func @_gcu_kernel(%arg0: i32, %arg1: memref<2x1024xf32, #tpu.memory_space<vmem>>, %arg2: memref<2x1024xf32, #tpu.memory_space<vmem>>) attributes {dimension_semantics = [#tpu.dimension_semantics<parallel>], iteration_bounds = array<i64: 1>, scalar_prefetch = 0 : i64, scratch_operands = 0 : i64, tpu.core_type = #tpu.core_type<tc>, window_params = [{transform_indices = @transform_0, window_bounds = array<i64: 2, 1024>}, {transform_indices = @transform_1, window_bounds = array<i64: 2, 1024>}]} {
    %c0 = arith.constant 0 : index
    %c0_0 = arith.constant 0 : index
    %0 = vector.load %arg1[%c0, %c0_0] : memref<2x1024xf32, #tpu.memory_space<vmem>>, vector<2x1024xf32>
    %1 = math.cos %0 : vector<2x1024xf32>
    %2 = arith.mulf %0, %1 : vector<2x1024xf32>
    %c0_1 = arith.constant 0 : index
    %c0_2 = arith.constant 0 : index
    %3 = vector.load %arg2[%c0_1, %c0_2] : memref<2x1024xf32, #tpu.memory_space<vmem>>, vector<2x1024xf32>
    tpu.vector_store %arg2[%c0_1, %c0_2], %2 {strides = array<i32>} : memref<2x1024xf32, #tpu.memory_space<vmem>>, vector<2x1024xf32>,
    return
  }
  func.func @transform_0(%arg0: i32) -> (i32, i32) {
    %c0_i32 = arith.constant 0 : i32
    %c0_i32_0 = arith.constant 0 : i32
    return %arg0, %c0_i32 : i32, i32
  }
  func.func @transform_1(%arg0: i32) -> (i32, i32) {
    %c0_i32 = arith.constant 0 : i32
    %c0_i32_0 = arith.constant 0 : i32
    return %arg0, %c0_i32 : i32, i32
  }
}

</mosaic_0001>

<bundles_post_ra>
// kernel: tpu_custom_call.1
= control target key start
LH: loop header
LB: loop body
LE: loop exit
PB: predicated region body
PF: predicated region fallthrough
CT: control target
= control target key end

     0   :  { %6 = vsyncpa [#allocation3], 0  ;;  %s629_s0 = inlined_call_operand.hbm [shape: f32[2,1024], index: 0, kind: input, shape index: {}]   ;;  %s630_s1 = inlined_call_operand.hbm [shape: f32[2,1024], index: 1, kind: output, shape index: {}]  }
   0x1   :  { %7 = vsyncpa [#allocation4], 0  ;;  %s13_s8 = sshll.u32 %s629_s0, 4  ;;  %s421_s9 = smov [#allocation2]   ;;  %s14_s8 = int_to_ptr.hbm [resolvable:$true] %s13_s8 }
   0x2   :  { %s15_s10 = sshll.u32 %s421_s9, 4  ;;  %s16_s10 = int_to_ptr.vmem [resolvable:$true] %s15_s10 }
   0x3   :  { %18 = dma.hbm_to_vmem [thread:$0]  %s14_s8, 256, %s16_s10, [#allocation3]  }
   0x4   :  { %417 = dma.done.wait [#allocation3], 256  }
   0x5   :  { %418 = vsyncadd [#allocation3], 4294967040  ;;  %v443_v0 = vld [vmem:[#allocation2] sm:$0xff]  ;;  %v445_v1 = vld [vmem:[#allocation2 + $0x8] sm:$0xff]  ;;  %v422_v23 = vmov 683565275  }
   0x6   :  { %v25_v2 = vand.u32 2147483647, %v443_v0  ;;  %v28_v3 = vand.u32 2139095040, %v443_v0  ;;  %v179_v4 = vand.u32 2147483647, %v445_v1  ;;  %v182_v5 = vand.u32 2139095040, %v445_v1 }
   0x7   :  { %v423_v25 = vmov 2475754826   ;;  %v424_v27 = vmov 2131351028   ;;  %v425_v29 = vmov 2102212464  }
   0x8   :  { %v29_v6 = vshrl.u32 %v28_v3, 23  ;;  %v32_v7 = vand.u32 8388607, %v25_v2  ;;  %v183_v8 = vshrl.u32 %v182_v5, 23  ;;  %v186_v12 = vand.u32 8388607, %v179_v4 }
   0x9   :  { %v426_v31 = vmov 920167782   ;;  %v427_v40 = vmov 1326507024   ;;  %s429_s0 = smov [#allocation5]   ;;  %s344_s14 = sshll.u32 %s630_s1, 4  ;;  %s345_s14 = int_to_ptr.hbm [resolvable:$true] %s344_s14 }
   0xa   :  { %v354_v9 = vadd.s32 4294967169, %v29_v6  ;;  %v33_v10 = vor.u32 8388608, %v32_v7  ;;  %v357_v11 = vadd.s32 4294967169, %v183_v8  ;;  %v187_v17 = vor.u32 8388608, %v186_v12  ;;  %s342_s11 = sshll.u32 %s429_s0, 4  ;;  %s343_s11 = int_to_ptr.vmem [resolvable:$true] %s342_s11 }
   0xc   :  { %v35_v13 = vadd.s32 1, %v354_v9  ;;  %v189_v14 = vadd.s32 1, %v357_v11  ;;  %v455_v16 = vshll.u32 %v33_v10, 8  ;;  %v465_v34 = vshll.u32 %v187_v17, 8 }
   0xe   :  { %vm36_vm0 = vcmp.gt.s32.totalorder %v35_v13, 0  ;;  %vm190_vm1 = vcmp.gt.s32.totalorder %v189_v14, 0  ;;  %v74_v33 = vand.u32 65535, %v455_v16  ;;  %v75_v38 = vshrl.u32 %v455_v16, 16 }
   0xf   :  { %v37_v15 = vsel %vm36_vm0, %v35_v13, 0  ;;  %v191_v19 = vsel %vm190_vm1, %v189_v14, 0 }
  0x10   :  { %v39_v18 = vand.u32 31, %v37_v15  ;;  %v457_v20 = vshrl.u32 %v37_v15, 5  ;;  %v459_v21 = vand.u32 31, %v191_v19  ;;  %v483_v51 = vshrl.u32 %v191_v19, 5 }
  0x12   :  { %v40_v22 = vsub.s32 32, %v39_v18  ;;  %v42_v24 = vshll.u32 %v422_v23, %v39_v18  ;;  %v45_v26 = vshll.u32 %v423_v25, %v39_v18  ;;  %v48_v28 = vshll.u32 %v424_v27, %v39_v18 }
  0x13   :  { %v51_v30 = vshll.u32 %v425_v29, %v39_v18  ;;  %v54_v32 = vshll.u32 %v426_v31, %v39_v18  ;;  %vm57_vm2 = vcmp.lt.s32.totalorder %v457_v20, 1  ;;  %vm60_vm3 = vcmp.lt.s32.totalorder %v457_v20, 4 }
  0x14   :  { %v43_v35 = vshrl.u32 %v423_v25, %v40_v22  ;;  %v46_v36 = vshrl.u32 %v424_v27, %v40_v22  ;;  %v49_v37 = vshrl.u32 %v425_v29, %v40_v22  ;;  %v52_v39 = vshrl.u32 %v426_v31, %v40_v22 }
  0x15   :  { %v55_v41 = vshrl.u32 %v427_v40, %v40_v22  ;;  %v474_v45 = vsub.s32 32, %v459_v21  ;;  %v41_v46 = vshrl.u32 %v422_v23, %v40_v22  ;;  %vm59_vm4 = vcmp.lt.s32.totalorder %v457_v20, 3 }
  0x16   :  { %v44_v42 = vor.u32 %v43_v35, %v42_v24  ;;  %v47_v43 = vor.u32 %v46_v36, %v45_v26  ;;  %v50_v44 = vor.u32 %v49_v37, %v48_v28  ;;  %v53_v47 = vor.u32 %v52_v39, %v51_v30 }
  0x17   :  { %v56_v48 = vor.u32 %v55_v41, %v54_v32  ;;  %vm58_vm5 = vcmp.lt.s32.totalorder %v457_v20, 2  ;;  %v196_v54 = vshll.u32 %v422_v23, %v459_v21  ;;  %v199_v55 = vshll.u32 %v423_v25, %v459_v21 }
  0x18   :  { %v65_v49 = vsel %vm57_vm2, %v44_v42, %v47_v43  ;;  %v69_v50 = vsel %vm57_vm2, %v47_v43, %v50_v44  ;;  %v66_v52 = vsel %vm60_vm3, %v53_v47, 920167782  ;;  %v62_v56 = vsel %vm60_vm3, %v50_v44, 2102212464 }
  0x19   :  { %v70_v53 = vsel %vm60_vm3, %v56_v48, 1326507024  ;;  %v67_v57 = vsel %vm59_vm4, %v50_v44, %v66_v52  ;;  %v197_v59 = vshrl.u32 %v423_v25, %v474_v45  ;;  %v61_v60 = vsel %vm57_vm2, %v41_v46, %v44_v42 }
  0x1a   :  { %v71_v58 = vsel %vm59_vm4, %v53_v47, %v70_v53  ;;  %v68_v61 = vsel %vm58_vm5, %v65_v49, %v67_v57  ;;  %v200_v63 = vshrl.u32 %v424_v27, %v474_v45  ;;  %v63_v8 = vsel %vm59_vm4, %v47_v43, %v62_v56 }
  0x1b   :  { %v72_v62 = vsel %vm58_vm5, %v69_v50, %v71_v58  ;;  %v98_v6 = vand.u32 65535, %v68_v61  ;;  %v99_v7 = vshrl.u32 %v68_v61, 16  ;;  %v508_v9 = vor.u32 %v197_v59, %v196_v54 }
  0x1c   :  { %v76_v3 = vand.u32 65535, %v72_v62  ;;  %v77_v5 = vshrl.u32 %v72_v62, 16  ;;  %v510_v10 = vor.u32 %v200_v63, %v199_v55  ;;  %v202_v11 = vshll.u32 %v424_v27, %v459_v21 }
  0x1d   :  { %v203_v15 = vshrl.u32 %v425_v29, %v474_v45  ;;  %v100_v18 = vmul.u32 %v98_v6, %v74_v33  ;;  %v101_v19 = vmul.u32 %v99_v7, %v74_v33  ;;  %v102_v22 = vmul.u32 %v98_v6, %v75_v38 }
  0x1e   :  { %v78_v12 = vmul.u32 %v76_v3, %v74_v33  ;;  %v79_v13 = vmul.u32 %v77_v5, %v74_v33  ;;  %v80_v14 = vmul.u32 %v76_v3, %v75_v38  ;;  %v81_v17 = vmul.u32 %v77_v5, %v75_v38 }
  0x1f   :  { %v103_v28 = vmul.u32 %v99_v7, %v75_v38  ;;  %v104_v32 = vshll.u32 %v101_v19, 16  ;;  %v105_v35 = vshrl.u32 %v101_v19, 16  ;;  %v106_v36 = vshll.u32 %v102_v22, 16 }
  0x20   :  { %v82_v24 = vshll.u32 %v79_v13, 16  ;;  %v83_v25 = vshrl.u32 %v79_v13, 16  ;;  %v84_v26 = vshll.u32 %v80_v14, 16  ;;  %v85_v30 = vshrl.u32 %v80_v14, 16 }
  0x21   :  { %v107_v37 = vshrl.u32 %v102_v22, 16  ;;  %v205_v39 = vshll.u32 %v425_v29, %v459_v21  ;;  %v428_v41 = vmov 0   ;;  %vm108_vm7 = vc.u32 %v100_v18, %v104_v32 }
  0x22   :  { %vm86_vm6 = vc.u32 %v78_v12, %v82_v24  ;;  %v88_v27 = vadd.s32 %v82_v24, %v78_v12  ;;  %v110_v33 = vadd.s32 %v104_v32, %v100_v18  ;;  %v206_v43 = vshrl.u32 %v426_v31, %v474_v45 }
  0x23   :  { %v87_v42 = vsel %vm86_vm6, 1, %v428_v41  ;;  %v109_v38 = vsel %vm108_vm7, 1, %v428_v41  ;;  %v208_v46 = vshll.u32 %v426_v31, %v459_v21  ;;  %v204_v29 = vor.u32 %v203_v15, %v202_v11 }
  0x24   :  { %v89_v44 = vadd.s32 %v87_v42, %v81_v17  ;;  %vm90_vm8 = vc.u32 %v88_v27, %v84_v26  ;;  %v111_v48 = vadd.s32 %v109_v38, %v103_v28  ;;  %vm112_vm9 = vc.u32 %v110_v33, %v106_v36 }
  0x25   :  { %v91_v47 = vsel %vm90_vm8, 1, %v428_v41  ;;  %v113_v50 = vsel %vm112_vm9, 1, %v428_v41  ;;  %v207_v52 = vor.u32 %v206_v43, %v205_v39  ;;  %v209_v53 = vshrl.u32 %v427_v40, %v474_v45 }
  0x26   :  { %v93_v49 = vadd.s32 %v91_v47, %v89_v44  ;;  %v527_v54 = vadd.s32 %v110_v33, %v106_v36  ;;  %v115_v55 = vadd.s32 %v113_v50, %v111_v48  ;;  %vm211_vm10 = vcmp.lt.s32.totalorder %v483_v51, 1 }
  0x27   :  { %vm213_vm11 = vcmp.lt.s32.totalorder %v483_v51, 3  ;;  %v210_v31 = vor.u32 %v209_v53, %v208_v46  ;;  %vm212_vm12 = vcmp.lt.s32.totalorder %v483_v51, 2  ;;  %vm214_vm13 = vcmp.lt.s32.totalorder %v483_v51, 4 }
  0x28   :  { %v94_v21 = vadd.s32 %v93_v49, %v83_v25  ;;  %v64_v56 = vsel %vm58_vm5, %v61_v60, %v63_v8  ;;  %v116_v57 = vadd.s32 %v115_v55, %v105_v35  ;;  %v219_v40 = vsel %vm211_vm10, %v508_v9, %v510_v10 }
  0x29   :  { %v220_v58 = vsel %vm214_vm13, %v207_v52, 920167782  ;;  %v223_v62 = vsel %vm211_vm10, %v510_v10, %v204_v29  ;;  %v228_v20 = vand.u32 65535, %v465_v34  ;;  %v224_v3 = vsel %vm214_vm13, %v210_v31, 1326507024 }
  0x2a   :  { %v541_v59 = vadd.s32 %v94_v21, %v85_v30  ;;  %v221_v61 = vsel %vm213_vm11, %v204_v29, %v220_v58  ;;  %v117_v60 = vadd.s32 %v116_v57, %v107_v37  ;;  %v229_v5 = vshrl.u32 %v465_v34, 16 }
  0x2b   :  { %v222_v63 = vsel %vm212_vm12, %v219_v40, %v221_v61  ;;  %v118_v6 = vmul.u32 %v455_v16, %v64_v56  ;;  %v225_v7 = vsel %vm213_vm11, %v207_v52, %v224_v3  ;;  %v195_v18 = vshrl.u32 %v422_v23, %v474_v45 }
  0x2c   :  { %vm120_vm14 = vc.u32 %v541_v59, %v527_v54  ;;  %v252_v8 = vand.u32 65535, %v222_v63  ;;  %v121_v11 = vadd.s32 1, %v117_v60  ;;  %v226_v12 = vsel %vm212_vm12, %v223_v62, %v225_v7 }
  0x2d   :  { %v253_v13 = vshrl.u32 %v222_v63, 16  ;;  %v230_v14 = vand.u32 65535, %v226_v12  ;;  %v231_v15 = vshrl.u32 %v226_v12, 16  ;;  %v216_v35 = vsel %vm214_vm13, %v204_v29, 2102212464 }
  0x2e   :  { %v122_v17 = vsel %vm120_vm14, %v121_v11, %v117_v60  ;;  %v256_v16 = vmul.u32 %v252_v8, %v229_v5  ;;  %v254_v26 = vmul.u32 %v252_v8, %v228_v20  ;;  %v215_v37 = vsel %vm211_vm10, %v195_v18, %v508_v9 }
  0x2f   :  { %v255_v19 = vmul.u32 %v253_v13, %v228_v20  ;;  %v123_v22 = vadd.s32 %v122_v17, %v118_v6  ;;  %v232_v24 = vmul.u32 %v230_v14, %v228_v20  ;;  %v233_v25 = vmul.u32 %v231_v15, %v228_v20 }
  0x30   :  { %v234_v28 = vmul.u32 %v230_v14, %v229_v5  ;;  %v235_v36 = vmul.u32 %v231_v15, %v229_v5  ;;  %v257_v23 = vmul.u32 %v253_v13, %v229_v5  ;;  %v260_v45 = vshll.u32 %v256_v16, 16 }
  0x31   :  { %v258_v30 = vshll.u32 %v255_v19, 16  ;;  %v124_v32 = vadd.s32 536870912, %v123_v22  ;;  %v236_v27 = vshll.u32 %v233_v25, 16  ;;  %v217_v43 = vsel %vm213_vm11, %v510_v10, %v216_v35 }
  0x32   :  { %v238_v39 = vshll.u32 %v234_v28, 16  ;;  %v237_v9 = vshrl.u32 %v233_v25, 16  ;;  %v259_v49 = vshrl.u32 %v255_v19, 16  ;;  %v239_v53 = vshrl.u32 %v234_v28, 16 }
  0x33   :  { %v568_v42 = vshrl.u32 %v124_v32, 30  ;;  %vm240_vm15 = vc.u32 %v232_v24, %v236_v27  ;;  %v242_v33 = vadd.s32 %v236_v27, %v232_v24  ;;  %vm262_vm0 = vc.u32 %v254_v26, %v258_v30 }
  0x34   :  { %v241_v44 = vsel %vm240_vm15, 1, %v428_v41  ;;  %v263_v38 = vsel %vm262_vm0, 1, %v428_v41  ;;  %v264_v46 = vadd.s32 %v258_v30, %v254_v26  ;;  %v261_v21 = vshrl.u32 %v256_v16, 16 }
  0x35   :  { %v126_v47 = vshll.u32 %v568_v42, 30  ;;  %v243_v48 = vadd.s32 %v241_v44, %v235_v36  ;;  %vm244_vm1 = vc.u32 %v242_v33, %v238_v39  ;;  %v265_v50 = vadd.s32 %v263_v38, %v257_v23 }
  0x36   :  { %v245_v29 = vsel %vm244_vm1, 1, %v428_v41  ;;  %vm266_vm2 = vc.u32 %v264_v46, %v260_v45  ;;  %v268_v40 = vadd.s32 %v264_v46, %v260_v45  ;;  %v218_v58 = vsel %vm212_vm12, %v215_v37, %v217_v43 }
  0x37   :  { %v127_v52 = vsub.s32 %v123_v22, %v126_v47  ;;  %v247_v55 = vadd.s32 %v245_v29, %v243_v48  ;;  %v267_v10 = vsel %vm266_vm2, 1, %v428_v41  ;;  %v272_v3 = vmul.u32 %v465_v34, %v218_v58 }
  0x38   :  { %v269_v31 = vadd.s32 %v267_v10, %v265_v50  ;;  %v119_v41 = vadd.s32 %v527_v54, %v541_v59  ;;  %vm27_vm7 = vcmp.lt.s32.totalorder %v443_v0, 0  ;;  %vm589_vm8 = vcmp.le.f32.partialorder %v25_v2, 0.7853982 }
  0x39   :  { %vm128_vm3 = vcmp.lt.s32.totalorder %v127_v52, 0  ;;  %v129_v56 = vsub.s32 0, %v127_v52  ;;  %v248_v57 = vadd.s32 %v247_v55, %v237_v9  ;;  %v149_v37 = vsub.s32 4, %v568_v42 }
  0x3a   :  { %v270_v61 = vadd.s32 %v269_v31, %v259_v49  ;;  %vm181_vm11 = vcmp.lt.s32.totalorder %v445_v1, 0  ;;  %vm607_vm13 = vcmp.le.f32.partialorder %v179_v4, 0.7853982  ;;  %vm168_vm15 = vweird.f32 %v443_v0 }
  0x3b   :  { %v130_v62 = vsel %vm128_vm3, %v129_v56, %v127_v52  ;;  %v249_v20 = vadd.s32 %v248_v57, %v239_v53  ;;  %v150_v46 = vsel %vm27_vm7, %v149_v37, %v568_v42  ;;  %vm322_vm3 = vweird.f32 %v445_v1 }
  0x3c   :  { %v131_v60 = vclz %v130_v62  ;;  %v271_v63 = vadd.s32 %v270_v61, %v261_v21  ;;  %v152_v50 = vsel %vm589_vm8, 0, %v150_v46 }
  0x3d   :  { %vm274_vm4 = vc.u32 %v249_v20, %v268_v40  ;;  %v273_v45 = vadd.s32 %v268_v40, %v249_v20  ;;  %v169_v56 = vand.u32 3, %v152_v50 }
  0x3e   :  { %v355_v5 = vadd.s32 4294967294, %v131_v60  ;;  %v275_v6 = vadd.s32 1, %v271_v63 }
  0x3f   :  { %vm174_vm10 = vcmp.eq.s32.totalorder %v169_v56, 2  ;;  %vm171_vm12 = vcmp.eq.s32.totalorder %v169_v56, 0  ;;  %vm170_vm14 = vcmp.lt.s32.totalorder %v169_v56, 2 }
  0x40   :  { %vm356_vm5 = vcmp.lt.s32.totalorder %v355_v5, 0  ;;  %v276_v7 = vsel %vm274_vm4, %v275_v6, %v271_v63 }
  0x41   :  { %v134_v8 = vsel %vm356_vm5, 0, %v355_v5  ;;  %v277_v11 = vadd.s32 %v276_v7, %v272_v3 }
  0x42   :  { %v135_v12 = vsub.s32 32, %v134_v8  ;;  %v136_v51 = vshll.u32 %v127_v52, %v134_v8  ;;  %v139_v13 = vsub.s32 4294967266, %v134_v8 }
  0x43   :  { %v278_v14 = vadd.s32 536870912, %v277_v11 }
  0x44   :  { %v137_v15 = vshrl.u32 %v119_v41, %v135_v12  ;;  %v140_v17 = vadd.s32 127, %v139_v13 }
  0x45   :  { %v583_v18 = vshrl.u32 %v278_v14, 30 }
  0x46   :  { %v138_v19 = vor.u32 %v137_v15, %v136_v51  ;;  %v141_v34 = vshll.u32 %v140_v17, 23 }
  0x47   :  { %v280_v16 = vshll.u32 %v583_v18, 30  ;;  %v303_v12 = vsub.s32 4, %v583_v18 }
  0x48   :  { %v142_v22 = vor.u32 4788187, %v141_v34  ;;  %v145_v24 = vcvt.s32.f32 %v138_v19 }
  0x49   :  { %v281_v25 = vsub.s32 %v277_v11, %v280_v16  ;;  %v304_v34 = vsel %vm181_vm11, %v303_v12, %v583_v18 }
  0x4a   :  { %v143_v54 = vand.u32 2147483647, %v142_v22 }
  0x4b   :  { %vm282_vm6 = vcmp.lt.s32.totalorder %v281_v25, 0  ;;  %v283_v59 = vsub.s32 0, %v281_v25 }
  0x4c   :  { %v146_v26 = vmul.f32 %v145_v24, %v143_v54  ;;  %v306_v24 = vsel %vm607_vm13, 0, %v304_v34 }
  0x4d   :  { %v284_v28 = vsel %vm282_vm6, %v283_v59, %v281_v25 }
  0x4e   :  { %v147_v32 = vxor.u32 2147483648, %v146_v26  ;;  %v285_v35 = vclz %v284_v28  ;;  %v323_v28 = vand.u32 3, %v306_v24 }
  0x50   :  { %v148_v36 = vsel %vm27_vm7, %v147_v32, %v146_v26  ;;  %v358_v27 = vadd.s32 4294967294, %v285_v35  ;;  %vm328_vm0 = vcmp.eq.s32.totalorder %v323_v28, 2  ;;  %vm325_vm1 = vcmp.eq.s32.totalorder %v323_v28, 0 }
  0x51   :  { %v151_v39 = vsel %vm589_vm8, %v443_v0, %v148_v36  ;;  %vm324_vm2 = vcmp.lt.s32.totalorder %v323_v28, 2 }
  0x52   :  { %v153_v23 = vmul.f32 %v151_v39, %v151_v39  ;;  %vm359_vm9 = vcmp.lt.s32.totalorder %v358_v27, 0 }
  0x53   :  { %v288_v33 = vsel %vm359_vm9, 0, %v358_v27 }
  0x54   :  { %v154_v2 = vmul.f32 -0.001358992, %v153_v23  ;;  %v161_v43 = vmul.f32 -0.00019511016, %v153_v23  ;;  %v289_v44 = vsub.s32 32, %v288_v33  ;;  %v290_v38 = vshll.u32 %v281_v25, %v288_v33 }
  0x55   :  { %v293_v47 = vsub.s32 4294967266, %v288_v33 }
  0x56   :  { %v155_v9 = vadd.f32 0.041655596, %v154_v2  ;;  %v162_v48 = vadd.f32 0.008332121, %v161_v43  ;;  %v291_v29 = vshrl.u32 %v273_v45, %v289_v44 }
  0x57   :  { %v294_v49 = vadd.s32 127, %v293_v47 }
  0x58   :  { %v156_v52 = vmul.f32 %v155_v9, %v153_v23  ;;  %v163_v53 = vmul.f32 %v162_v48, %v153_v23  ;;  %v292_v55 = vor.u32 %v291_v29, %v290_v38 }
  0x59   :  { %v295_v10 = vshll.u32 %v294_v49, 23 }
  0x5a   :  { %v157_v21 = vadd.f32 -0.4999988, %v156_v52  ;;  %v164_v31 = vadd.f32 -0.16666654, %v163_v53  ;;  %v299_v40 = vcvt.s32.f32 %v292_v55 }
  0x5b   :  { %v296_v57 = vor.u32 4788187, %v295_v10 }
  0x5c   :  { %v158_v58 = vmul.f32 %v157_v21, %v153_v23  ;;  %v165_v61 = vmul.f32 %v164_v31, %v153_v23 }
  0x5d   :  { %v297_v42 = vand.u32 2147483647, %v296_v57 }
  0x5e   :  { %v159_v62 = vadd.f32 1.0, %v158_v58  ;;  %v166_v20 = vadd.f32 1.0, %v165_v61 }
  0x5f   :  { %v300_v60 = vmul.f32 %v299_v40, %v297_v42 }
  0x60   :  { %v167_v63 = vmul.f32 %v166_v20, %v151_v39  ;;  %v175_v3 = vxor.u32 2147483648, %v159_v62 }
  0x61   :  { %v301_v6 = vxor.u32 2147483648, %v300_v60 }
  0x62   :  { %v172_v41 = vxor.u32 2147483648, %v167_v63  ;;  %v176_v7 = vsel %vm174_vm10, %v175_v3, %v167_v63 }
  0x63   :  { %v302_v8 = vsel %vm181_vm11, %v301_v6, %v300_v60 }
  0x64   :  { %v173_v11 = vsel %vm171_vm12, %v159_v62, %v172_v41  ;;  %v305_v51 = vsel %vm607_vm13, %v445_v1, %v302_v8 }
  0x65   :  { %v177_v4 = vsel %vm170_vm14, %v173_v11, %v176_v7  ;;  %v307_v13 = vmul.f32 %v305_v51, %v305_v51 }
  0x66   :  { %v178_v14 = vsel %vm168_vm15, nan, %v177_v4 }
  0x67   :  { %v308_v15 = vmul.f32 -0.001358992, %v307_v13  ;;  %v315_v17 = vmul.f32 -0.00019511016, %v307_v13  ;;  %v333_v19 = vmul.f32 %v178_v14, %v443_v0 }
  0x69   :  { %v309_v16 = vadd.f32 0.041655596, %v308_v15  ;;  %v316_v22 = vadd.f32 0.008332121, %v315_v17  ;;  %335 = vst [vmem:[#allocation5] sm:$0xff] %v333_v19 }
  0x6b   :  { %v310_v25 = vmul.f32 %v309_v16, %v307_v13  ;;  %v317_v54 = vmul.f32 %v316_v22, %v307_v13 }
  0x6d   :  { %v311_v59 = vadd.f32 -0.4999988, %v310_v25  ;;  %v318_v26 = vadd.f32 -0.16666654, %v317_v54 }
  0x6f   :  { %v312_v30 = vmul.f32 %v311_v59, %v307_v13  ;;  %v319_v32 = vmul.f32 %v318_v26, %v307_v13 }
  0x71   :  { %v313_v35 = vadd.f32 1.0, %v312_v30  ;;  %v320_v36 = vadd.f32 1.0, %v319_v32 }
  0x73   :  { %v321_v0 = vmul.f32 %v320_v36, %v305_v51  ;;  %v329_v27 = vxor.u32 2147483648, %v313_v35 }
  0x75   :  { %v326_v18 = vxor.u32 2147483648, %v321_v0  ;;  %v330_v37 = vsel %vm328_vm0, %v329_v27, %v321_v0 }
  0x77   :  { %v327_v39 = vsel %vm325_vm1, %v313_v35, %v326_v18 }
  0x78   :  { %v331_v23 = vsel %vm324_vm2, %v327_v39, %v330_v37 }
  0x79   :  { %v332_v45 = vsel %vm322_vm3, nan, %v331_v23 }
  0x7a   :  { %v334_v33 = vmul.f32 %v332_v45, %v445_v1 }
  0x7c   :  { %336 = vst [vmem:[#allocation5 + $0x8] sm:$0xff] %v334_v33 }
  0x7d   :  { %347 = dma.vmem_to_hbm [thread:$0]  %s343_s11, 256, %s345_s14, [#allocation4]  }
  0x7e   :  { %419 = dma.done.wait [#allocation4], 256  }
  0x7f   :  { %420 = vsyncadd [#allocation4], 4294967040 }
  0x80   :  { %352 = vsyncpa [#allocation3], 1 }
  0x81   :  { %353 = vsyncpa [#allocation4], 1 }

</bundles_post_ra>
